<compile_context>
chip_gen: v5e
topology: v5e:2x2
jax: 0.10.0
libtpu: 0.0.40
codegen_flags: <defaults>
</compile_context>

<pallas_src>
import jax
import jax.numpy as jnp
from jax.experimental import pallas as pl
from jax.experimental.pallas import tpu as pltpu


LANES = 128            # lane width of a vreg: last dim is lane-dense
MAX_TILE_ROWS = 4096   # 4096 x 128 f32 = 2 MiB / block; 8 MiB total w/ dbl-buffered in+out
SMALL_N_FASTPATH = 1024  # below this, kernel dispatch + padding dominate; use plain XLA

_SUBLANE_FOR_ITEMSIZE = {4: 8, 2: 16, 1: 32}  # packed-tile sublane multiple per dtype width


def linear_kernel(wb_ref, x_ref, o_ref):
    # wb_ref: SMEM (2,) scalars [weight, bias]   (scalar-prefetch arg)
    # x_ref : VMEM (tile_rows, 128) lane-dense slab of the batch
    # o_ref : VMEM (tile_rows, 128) output slab
    w = wb_ref[0]
    b = wb_ref[1]
    # Pure VPU multiply-add; scalar broadcast from SMEM is free.
    o_ref[...] = (x_ref[...] * w + b).astype(o_ref.dtype)


def _round_up(v, m):
    return ((v + m - 1) // m) * m


def linear_forward(x, weight, bias):
    """torch.nn.Linear(1, 1) forward: x (N, 1) -> (N, 1)."""
    n, in_features = x.shape
    out_features = weight.shape[0]
    assert in_features == 1 and out_features == 1, "kernel specialized for Linear(1, 1)"

    w_scalar = weight.reshape(()).astype(jnp.float32)
    b_scalar = bias.reshape(()).astype(jnp.float32)

    # --- small-N fast path: fused XLA mul-add beats kernel dispatch ---------
    if n < SMALL_N_FASTPATH:
        return (x.astype(jnp.float32) * w_scalar + b_scalar).astype(x.dtype)

    itemsize = jnp.dtype(x.dtype).itemsize
    sublane = _SUBLANE_FOR_ITEMSIZE.get(itemsize, 8)

    # --- layout plumbing (plain JAX) -----------------------------------------
    flat = x.reshape(-1)                                   # (N,)
    rows = pl.cdiv(n, LANES)                               # rows of the 128-lane slab
    rows_rounded = max(sublane, _round_up(rows, sublane))  # packed-tile sublane multiple

    if rows_rounded <= sublane:
        grid_rows = 1
        tile_rows = rows_rounded
    else:
        # >= 2 grid steps so v7x's two TensorCores both pull HBM; tiles capped
        # at ~2 MiB to amortize the ~0.35 us per-grid-step overhead while
        # staying far under the scoped-VMEM defaults (16 MiB v5e, 32 MiB v6e/v7x).
        grid_rows = max(2, pl.cdiv(rows_rounded, MAX_TILE_ROWS))
        tile_rows = _round_up(pl.cdiv(rows_rounded, grid_rows), sublane)
        grid_rows = pl.cdiv(rows_rounded, tile_rows)

    padded_rows = grid_rows * tile_rows
    padded_n = padded_rows * LANES

    if padded_n != n:
        # Ragged tail only; aligned inputs take the zero-copy path below.
        # TODO(synk): mask the final tile's store in-kernel (pass n via scalar
        # prefetch) to avoid this padded copy for ragged N as well.
        flat = jnp.pad(flat, (0, padded_n - n))
    slab = flat.reshape(padded_rows, LANES)                # lane-dense (rows, 128)

    # weight/bias as SMEM scalars (scalar prefetch).
    wb = jnp.stack([w_scalar, b_scalar])                   # (2,) float32

    # --- Pallas call ----------------------------------------------------------
    out_slab = pl.pallas_call(
        linear_kernel,
        out_shape=jax.ShapeDtypeStruct((padded_rows, LANES), x.dtype),
        grid_spec=pltpu.PrefetchScalarGridSpec(
            num_scalar_prefetch=1,
            grid=(grid_rows,),
            in_specs=[
                pl.BlockSpec((tile_rows, LANES), lambda i, wb: (i, 0)),
            ],
            out_specs=pl.BlockSpec((tile_rows, LANES), lambda i, wb: (i, 0)),
        ),
        compiler_params=pltpu.CompilerParams(
            dimension_semantics=("parallel",),  # shard grid across v7x's 2 TCs
        ),
    )(wb, slab)

    # Undo layout plumbing (no-op slice when N was already aligned).
    out_flat = out_slab.reshape(-1)
    if padded_n != n:
        out_flat = out_flat[:n]
    return out_flat.reshape(n, out_features)


if __name__ == "__main__":
    key = jax.random.PRNGKey(0)
    kx, kw, kb = jax.random.split(key, 3)

    # Deterministic parameter init mimicking PyTorch's uniform(-bound, bound)
    # (fan_in = 1 => bound = 1.0).
    weight = jax.random.uniform(kw, (1, 1), dtype=jnp.float32, minval=-1.0, maxval=1.0)
    bias = jax.random.uniform(kb, (1,), dtype=jnp.float32, minval=-1.0, maxval=1.0)

    # batch=8 exercises the small-N fast path (the shape Linear(1,1) demos use);
    # batch=4096 exercises the Pallas kernel on the aligned zero-copy path with
    # 2 grid steps; batch=5000 exercises the ragged-tail (padded) path.
    for batch in (8, 4096, 5000):
        x = jax.random.normal(kx, (batch, 1), dtype=jnp.float32)
        y = linear_forward(x, weight, bias)
        jax.block_until_ready(y)

        y_ref = x @ weight.T + bias
        assert y.shape == (batch, 1)
        assert jnp.allclose(y, y_ref, atol=1e-6), f"mismatch vs reference at batch={batch}"

    print("KERNEL_OK")
</pallas_src>

<mosaic_0001>
module attributes {stable_mosaic.version = 11 : i64} {
  func.func @linear_kernel(%arg0: i32, %arg1: memref<2xf32, #tpu.memory_space<smem>>, %arg2: memref<16x128xf32, #tpu.memory_space<vmem>>, %arg3: memref<16x128xf32, #tpu.memory_space<vmem>>) attributes {dimension_semantics = [#tpu.dimension_semantics<parallel>], iteration_bounds = array<i64: 2>, scalar_prefetch = 1 : i64, scratch_operands = 0 : i64, tpu.core_type = #tpu.core_type<tc>, window_params = [{transform_indices = @transform_0, window_bounds = array<i64: 16, 128>}, {transform_indices = @transform_1, window_bounds = array<i64: 16, 128>}]} {
    %c0 = arith.constant 0 : index
    %0 = memref.load %arg1[%c0] : memref<2xf32, #tpu.memory_space<smem>>
    %c1 = arith.constant 1 : index
    %1 = memref.load %arg1[%c1] : memref<2xf32, #tpu.memory_space<smem>>
    %c0_0 = arith.constant 0 : index
    %c0_1 = arith.constant 0 : index
    %2 = vector.load %arg2[%c0_0, %c0_1] : memref<16x128xf32, #tpu.memory_space<vmem>>, vector<16x128xf32>
    %3 = vector.broadcast %0 : f32 to vector<16x128xf32>
    %4 = arith.mulf %2, %3 : vector<16x128xf32>
    %5 = vector.broadcast %1 : f32 to vector<16x128xf32>
    %6 = arith.addf %4, %5 : vector<16x128xf32>
    %c0_2 = arith.constant 0 : index
    %c0_3 = arith.constant 0 : index
    %7 = vector.load %arg3[%c0_2, %c0_3] : memref<16x128xf32, #tpu.memory_space<vmem>>, vector<16x128xf32>
    tpu.vector_store %arg3[%c0_2, %c0_3], %6 {strides = array<i32>} : memref<16x128xf32, #tpu.memory_space<vmem>>, vector<16x128xf32>,
    return
  }
  func.func @transform_0(%arg0: i32, %arg1: memref<2xf32, #tpu.memory_space<smem>>) -> (i32, i32) {
    %c0_i32 = arith.constant 0 : i32
    %c0_i32_0 = arith.constant 0 : i32
    return %arg0, %c0_i32 : i32, i32
  }
  func.func @transform_1(%arg0: i32, %arg1: memref<2xf32, #tpu.memory_space<smem>>) -> (i32, i32) {
    %c0_i32 = arith.constant 0 : i32
    %c0_i32_0 = arith.constant 0 : i32
    return %arg0, %c0_i32 : i32, i32
  }
}

</mosaic_0001>

<bundles_post_ra>
// kernel: tpu_custom_call.1
= control target key start
LH: loop header
LB: loop body
LE: loop exit
PB: predicated region body
PF: predicated region fallthrough
CT: control target
= control target key end

     0   :  { %s429_s12 = smov [#allocation3]   ;;  %s579_s0 = inlined_call_operand.hbm [shape: f32[2], index: 0, kind: input, shape index: {}]   ;;  %s580_s1 = inlined_call_operand.hbm [shape: f32[32,128], index: 1, kind: input, shape index: {}]   ;;  %s581_s2 = inlined_call_operand.hbm [shape: f32[32,128], index: 2, kind: output, shape index: {}]  }
   0x1   :  { %s8_s11 = sshll.u32 %s579_s0, 4  ;;  %s9_s11 = int_to_ptr.hbm [resolvable:$true] %s8_s11 }
   0x2   :  { %11 = dma.hbm_to_smem %s9_s11, 16, %s429_s12, [#allocation2] }
   0x3   :  { %403 = dma.done.wait [#allocation2], 16 }
   0x4   :  { %404 = vsyncadd [#allocation2], 4294967280 }
   0x5   :  { %14 = sfence }
   0x6   :  { %15 = vsyncpa [#allocation5], 0 }
   0x7   :  { %17 = vsyncpa [#allocation5 + $0x1], 0 }
   0x8   :  { %18 = vsyncpa [#allocation6], 0 }
   0x9   :  { %20 = vsyncpa [#allocation6 + $0x1], 0  ;;  %s452_s13 = smov 0   ;;  %s454_s14 = smov 0  }
   0xa   :  { %s456_s15 = smov 0   ;;  %s458_s16 = smov 0  }
   0xb LB: > { %s473_s0 = sadd.s32 4294967295, %s427_s16   ;;  %s249_s17 = sadd.s32 4294967294, %s427_s16   ;;  %s427_s16 = sphi %s458_s16, %s591_s16   ;;  %s423_s15 = sphi %s456_s15, %s590_s15   ;;  %s419_s14 = sphi %s454_s14, %s589_s14   ;;  %s415_s13 = sphi %s452_s13, %s588_s13  }
   0xc   : > { %s477_s18 = sadd.s32 1, %s427_s16   ;;  %s33_s19 = sadd.s32 1, %s423_s15 }
   0xd   : > { %s30_s20 = ssub.s32 %s427_s16, %s477_s18  ;;  %p40_p0 = scmp.ne.s32.totalorder %s423_s15, %s419_s14 }
   0xe   : > { %p31_p1 = scmp.eq.s32.totalorder %s30_s20, 0  ;;  %p41_p2 = scmp.eq.s32.totalorder %s427_s16, 0 }
   0xf   : > { %p46_p3 = scmp.ne.s32.totalorder %s419_s14, %s415_s13  ;;  %p47_p4 = scmp.eq.s32.totalorder %s473_s0, 0 }
  0x10   : > { %s489_s21 = scalar_select %p31_p1, %s423_s15, %s33_s19  }
  0x11   : > { %p491_p5 = por %p41_p2, %p40_p0  ;;  %p495_p6 = por %p47_p4, %p46_p3 }
  0x12   : > { %p70_p7 = scmp.eq.s32.totalorder %s473_s0, 1  ;;  %p76_p8 = scmp.eq.s32.totalorder %s249_s17, 1 }
  0x13   : > { %p278_p10 = scmp.lt.s32.totalorder %s427_s16, 2  ;;  %s96_s26 = sand.u32 1, %s423_s15  }
  0x14   : > { %p502_p11 = por %p70_p7, %p40_p0  ;;  %p506_p12 = por %p76_p8, %p46_p3 }
  0x15   : > { %s264_s27 = sshll.u32 %s427_s16, 4  ;;  %s252_s28 = sshll.u32 %s96_s26, 4 }
  0x16   : > { %s105_s3 = scalar_lea.hbm %s580_s1, %s264_s27  ;;  %s100_s5 = scalar_lea.vmem [#allocation4], %s252_s28 }
  0x17   : > { %s106_s4 = sshll.u32 %s105_s3, 4  ;;  %s108_s6 = sshll.u32 %s100_s5, 4  ;;  %s107_s4 = int_to_ptr.hbm [resolvable:$true] %s106_s4  ;;  %s109_s6 = int_to_ptr.vmem [resolvable:$true] %s108_s6 }
  0x18   : > { %p517_p13 = pnand %p278_p10, %p491_p5  ;;  %p255_p0 = scmp.ge.s32.totalorder %s427_s16, 1 }
  0x19   : > { %p116_p1 = scmp.lt.s32.totalorder %s427_s16, 3  ;;  %s97_s8 = scalar_lea.sflag [#allocation5], %s96_s26 }
  0x1a   : > { %s329_s9 = sshra.s32 %s107_s4, 4  ;;  %p333_p3 = pneg %p517_p13  ;;  %s330_s9 = int_to_ptr.hbm [resolvable:$true] %s329_s9 }
  0x1b   : > { %s331_s10 = scalar_lea.hbm %s330_s9, 16  ;;  %s336_s17 = scalar_lea.hbm %s580_s1, 32 }
  0x1c   : > { %p332_p2 = scmp.ne.s32.totalorder %s330_s9, %s331_s10  ;;  %p337_p5 = scmp.lt.s32.totalorder %s330_s9, %s580_s1 }
  0x1d   : > { %p338_p8 = scmp.lt.s32.totalorder %s336_s17, %s331_s10 }
  0x1e   : > { %p334_p4 = pnand %p333_p3, %p332_p2 }
  0x1f   : > { %p339_p10 = por %p338_p8, %p337_p5 }
  0x20   : > { %p335_p7 = pneg %p334_p4 }
  0x22   : > { %p340_p9 = pnand %p339_p10, %p335_p7 }
  0x24   : > { %343 = shalt.err (!%p340_p9)
}
  0x25   : > { %s430_s22 = smov 128   ;;  %s431_s26 = smov 8  }
  0x26   : > { %273 = dma.hbm_to_vmem [thread:$0]  (!%p517_p13), %s107_s4, 256, %s109_s6, %s97_s8, %s430_s22, %s430_s22, %s431_s26  }
  0x27   : > { %p117_p2 = pnand %p255_p0, %p116_p1 }
  0x28   : > { %s538_s27 = sand.u32 (!%p117_p2), 1, %s419_s14  }
  0x29   : > { %120 = sbr.rel (%p117_p2) target bundleno = 64 (0x40), region = 24  ;;  %s256_s28 = sshll.u32 (!%p117_p2), %s538_s27, 4 }
  0x2a   : > { %s123_s29 = scalar_lea.sflag (!%p117_p2), [#allocation5], %s538_s27  ;;  %s126_s30 = scalar_lea.vmem (!%p117_p2), [#allocation4], %s256_s28 }
  0x2e   : > { %406 = dma.done.wait (%p495_p6), %s123_s29, 256  }
  0x2f   : > { %408 = vsyncadd (%p495_p6), %s123_s29, 4294967040  ;;  %s148_s3 = sld [smem:[#allocation3]]  ;;  %s265_s5 = sshll.u32 %s473_s0, 4  ;;  %v150_v0 = vld [vmem:[%s126_s30] sm:$0xff]  ;;  %v151_v2 = vld [vmem:[%s126_s30 + $0x8] sm:$0xff] }
  0x30   : > { %s258_s4 = sld [smem:[#allocation3 + $0x1]]  ;;  %s172_s8 = scalar_lea.hbm %s581_s2, %s265_s5 }
  0x31   : > { %s145_s9 = scalar_lea.vmem [#allocation7], %s256_s28  ;;  %s175_s23 = sshll.u32 %s172_s8, 4  ;;  %s176_s23 = int_to_ptr.hbm [resolvable:$true] %s175_s23 }
  0x32   : > { %s173_s10 = sshll.u32 %s145_s9, 4  ;;  %s161_s0 = scalar_lea.sflag [#allocation6], %s538_s27  ;;  %s174_s10 = int_to_ptr.vmem [resolvable:$true] %s173_s10 }
  0x33   : > { %s373_s11 = sshra.s32 %s176_s23, 4  ;;  %s379_s20 = scalar_lea.hbm %s581_s2, 32  ;;  %s374_s11 = int_to_ptr.hbm [resolvable:$true] %s373_s11 }
  0x34   : > { %s375_s12 = scalar_lea.hbm %s374_s11, 16  ;;  %p380_p0 = scmp.lt.s32.totalorder %s374_s11, %s581_s2 }
  0x35   : > { %v152_v1 = vstv %s148_s3  ;;  %p376_p6 = scmp.ne.s32.totalorder %s374_s11, %s375_s12  ;;  %p381_p1 = scmp.lt.s32.totalorder %s379_s20, %s375_s12 }
  0x36   : > { %v153_v3 = vmul.f32 %v152_v1, %v150_v0  ;;  %v155_v4 = vstv %s258_s4  ;;  %v154_v5 = vmul.f32 %v152_v1, %v151_v2 }
  0x37   : > { %p377_p9 = pnand %p376_p6, %p502_p11  ;;  %p382_p3 = por %p381_p1, %p380_p0 }
  0x38   : > { %v156_v6 = vadd.f32 %v155_v4, %v153_v3  ;;  %v157_v7 = vadd.f32 %v155_v4, %v154_v5 }
  0x39   : > { %p378_p13 = pneg %p377_p9 }
  0x3a   : > { %158 = vst [vmem:[%s145_s9] sm:$0xff] %v156_v6 }
  0x3b   : > { %159 = vst [vmem:[%s145_s9 + $0x8] sm:$0xff] %v157_v7  ;;  %p383_p4 = pnand %p382_p3, %p378_p13 }
  0x3d   : > { %386 = shalt.err (!%p383_p4)
}
  0x3e   : > { %s432_s27 = smov 128   ;;  %s433_s28 = smov 8  }
  0x3f   : > { %268 = dma.vmem_to_hbm [thread:$0]  (%p502_p11), %s174_s10, 256, %s176_s23, %s161_s0, %s432_s27, %s432_s27, %s433_s28  }
  0x40 PF: > { %s190_s29 = sand.u32 1, %s415_s13   ;;  %p587_p7 = scmp.ge.s32.totalorder %s427_s16, 2 }
  0x41   : > { %s191_s30 = scalar_lea.sflag [#allocation6], %s190_s29 }
  0x42   : > { %p275_p5 = pnand %p587_p7, %p506_p12 }
  0x44   : > { %p276_p8 = pneg %p275_p5 }
  0x46   : > { %410 = dma.done.wait (%p276_p8), %s191_s30, 256  }
  0x47   : > { %412 = vsyncadd (%p276_p8), %s191_s30, 4294967040  ;;  %p23_p10 = scmp.ge.s32.totalorder %s477_s18, 4   ;;  %s588_s13 = smov %s419_s14 }
  0x48   : > { %s589_s14 = smov %s423_s15  ;;  %s590_s15 = smov %s489_s21 }
  0x49   : > { %s591_s16 = smov %s477_s18  ;;  %25 = sbr.rel (!%p23_p10) target bundleno = 11 (0xb), region = 69 }
  0x4e   :  { %197 = vsyncpa [#allocation5], 1 }
  0x4f   :  { %199 = vsyncpa [#allocation5 + $0x1], 1 }
  0x50   :  { %200 = vsyncpa [#allocation6], 1 }
  0x51   :  { %202 = vsyncpa [#allocation6 + $0x1], 1 }

</bundles_post_ra>
